<compile_context>
chip_gen: v6e
topology: v6e:2x2x1
jax: 0.10.0
libtpu: 0.0.40
codegen_flags: <defaults>
</compile_context>

<pallas_src>
import functools

import jax
import jax.numpy as jnp
from jax.experimental import pallas as pl
from jax.experimental.pallas import tpu as pltpu


def _round_up(x, m):
    return ((x + m - 1) // m) * m


def _choose_tm(M, K):
    # Large-K layers get a smaller row cap so x-tile + resident full-K weights
    # stay inside the 32 MiB scoped-VMEM budget on every TPU generation.
    tm_max = 512 if K <= 2048 else 256
    # Ensure at least two M tiles so the "parallel" M axis spans both
    # TensorCores on v7x (harmless on single-TC v5e/v6e).
    tm = min(tm_max, max(16, _round_up(-(-M // 2), 16)))
    mp = _round_up(M, tm)
    return tm, mp, mp // tm


_CPARAMS = pltpu.CompilerParams(
    dimension_semantics=("parallel",),
    vmem_limit_bytes=32 * 1024 * 1024,
)


# ----------------------------------------------------------------------------
# Kernel 1a: M-tiled full-K GEMM (conv as im2col GEMM) with fused LeakyReLU.
# ----------------------------------------------------------------------------
def _gemm_act_kernel(x_ref, w_ref, o_ref, *, alpha):
    acc = jnp.dot(x_ref[...], w_ref[...], preferred_element_type=jnp.float32)
    if alpha is not None:
        acc = jnp.where(acc >= 0, acc, alpha * acc)
    o_ref[...] = acc.astype(o_ref.dtype)


# ----------------------------------------------------------------------------
# Kernel 1b: same GEMM, raw bf16 output + per-M-tile partial (sum, sumsq)
# channel stats computed from the f32 accumulator (for BatchNorm layers).
# ----------------------------------------------------------------------------
def _gemm_stats_kernel(x_ref, w_ref, o_ref, stats_ref):
    acc = jnp.dot(x_ref[...], w_ref[...], preferred_element_type=jnp.float32)
    o_ref[...] = acc.astype(o_ref.dtype)
    c = acc.shape[1]
    s = jnp.sum(acc, axis=0, keepdims=True)          # (1, C)
    ss = jnp.sum(acc * acc, axis=0, keepdims=True)   # (1, C)
    row = jax.lax.broadcasted_iota(jnp.int32, (8, c), 0)
    blk = jnp.where(row == 0, s, jnp.where(row == 1, ss, 0.0))
    stats_ref[...] = blk[None]                        # (1, 8, C)


# ----------------------------------------------------------------------------
# Kernel 2: BatchNorm finalize (fold stats -> per-channel affine) + LeakyReLU.
# Recomputed per M tile (cheap, per-channel) so the "parallel" grid axis is
# safe under megacore sharding (no cross-tile scratch dependence).
# ----------------------------------------------------------------------------
def _bn_lrelu_kernel(x_ref, part_ref, gamma_ref, beta_ref, o_ref,
                     *, alpha, m_true, eps):
    part = part_ref[...]                              # (nm, 8, C) f32
    s = jnp.sum(part[:, 0, :], axis=0, keepdims=True)   # (1, C)
    ss = jnp.sum(part[:, 1, :], axis=0, keepdims=True)  # (1, C)
    inv_m = 1.0 / m_true
    mu = s * inv_m
    var = jnp.maximum(ss * inv_m - mu * mu, 0.0)      # biased var, clamped
    rstd = jax.lax.rsqrt(var + eps)
    scale = gamma_ref[...] * rstd                     # (1, C)
    bias = beta_ref[...] - mu * scale                 # (1, C)
    y = x_ref[...].astype(jnp.float32) * scale + bias
    o_ref[...] = jnp.where(y >= 0, y, alpha * y).astype(o_ref.dtype)


# ----------------------------------------------------------------------------
# Glue: im2col patch extraction (pure data movement, plain JAX; bf16 output).
# ----------------------------------------------------------------------------
def im2col(x_nhwc, ksize, stride, pad):
    # TODO(synk): avoid materializing the im2col matrix in HBM by lowering the
    # conv as a sum of kh*kw shifted GEMMs from a VMEM-resident input slab;
    # this is the largest remaining HBM-bandwidth lever (4x / 16x inflation).
    x = x_nhwc.astype(jnp.bfloat16)
    N, H, W, C = x.shape
    xp = jnp.pad(x, ((0, 0), (pad, pad), (pad, pad), (0, 0)))
    Ho = (H + 2 * pad - ksize) // stride + 1
    Wo = (W + 2 * pad - ksize) // stride + 1
    cols = []
    for i in range(ksize):
        for j in range(ksize):
            cols.append(xp[:, i:i + stride * (Ho - 1) + 1:stride,
                           j:j + stride * (Wo - 1) + 1:stride, :])
    p = jnp.stack(cols, axis=3)                       # (N, Ho, Wo, k*k, C)
    p = p.reshape(N * Ho * Wo, ksize * ksize * C)     # K order: (i, j, cin)
    return p, (N, Ho, Wo)


def conv_block(x_nhwc, w_hwio, stride, gamma=None, beta=None, alpha=0.2,
               out_dtype=jnp.bfloat16):
    """Conv2d(k=4, stride, pad=1, bias=False) [+ BatchNorm(batch stats)] +
    LeakyReLU(alpha). gamma is None => no BatchNorm. alpha=None => no act."""
    ksize = w_hwio.shape[0]
    cout = w_hwio.shape[-1]
    coutp = max(128, _round_up(cout, 128))   # lane-dense output columns

    patches, (N, Ho, Wo) = im2col(x_nhwc, ksize, stride, 1)
    M, K = patches.shape

    wflat = w_hwio.reshape(-1, cout).astype(jnp.bfloat16)
    if coutp != cout:
        wflat = jnp.pad(wflat, ((0, 0), (0, coutp - cout)))

    tm, mp, nm = _choose_tm(M, K)
    if mp != M:
        patches = jnp.pad(patches, ((0, mp - M), (0, 0)))

    x_spec = pl.BlockSpec((tm, K), lambda i: (i, 0))
    w_spec = pl.BlockSpec((K, coutp), lambda i: (0, 0))   # resident weights
    o_spec = pl.BlockSpec((tm, coutp), lambda i: (i, 0))

    if gamma is None:
        out_p = pl.pallas_call(
            functools.partial(_gemm_act_kernel, alpha=alpha),
            out_shape=jax.ShapeDtypeStruct((mp, coutp), out_dtype),
            grid=(nm,),
            in_specs=[x_spec, w_spec],
            out_specs=o_spec,
            compiler_params=_CPARAMS,
        )(patches, wflat)
    else:
        raw_p, part = pl.pallas_call(
            _gemm_stats_kernel,
            out_shape=(jax.ShapeDtypeStruct((mp, coutp), jnp.bfloat16),
                       jax.ShapeDtypeStruct((nm, 8, coutp), jnp.float32)),
            grid=(nm,),
            in_specs=[x_spec, w_spec],
            out_specs=[o_spec,
                       pl.BlockSpec((1, 8, coutp), lambda i: (i, 0, 0))],
            compiler_params=_CPARAMS,
        )(patches, wflat)

        gamma_p = jnp.pad(gamma, (0, coutp - cout)) if coutp != cout else gamma
        beta_p = jnp.pad(beta, (0, coutp - cout)) if coutp != cout else beta

        out_p = pl.pallas_call(
            functools.partial(_bn_lrelu_kernel, alpha=alpha,
                              m_true=float(M), eps=1e-5),
            out_shape=jax.ShapeDtypeStruct((mp, coutp), out_dtype),
            grid=(nm,),
            in_specs=[
                pl.BlockSpec((tm, coutp), lambda i: (i, 0)),
                pl.BlockSpec((nm, 8, coutp), lambda i: (0, 0, 0)),
                pl.BlockSpec((1, coutp), lambda i: (0, 0)),
                pl.BlockSpec((1, coutp), lambda i: (0, 0)),
            ],
            out_specs=pl.BlockSpec((tm, coutp), lambda i: (i, 0)),
            compiler_params=_CPARAMS,
        )(raw_p, part,
          gamma_p.reshape(1, coutp).astype(jnp.float32),
          beta_p.reshape(1, coutp).astype(jnp.float32))

    return out_p[:M, :cout].reshape(N, Ho, Wo, cout)


# ----------------------------------------------------------------------------
# Discriminator forward (PatchGAN).
# ----------------------------------------------------------------------------
def discriminator_forward(params, input_image, target_image):
    # inputs are NCHW (PyTorch); concatenate along channels then go NHWC.
    x = jnp.concatenate([input_image, target_image], axis=1)
    x = jnp.transpose(x, (0, 2, 3, 1)).astype(jnp.float32)

    x = conv_block(x, params["w1"], 2, None, None, 0.2)                  # down1 (no BN)
    x = conv_block(x, params["w2"], 2, params["g2"], params["b2"], 0.2)  # down2
    x = conv_block(x, params["w3"], 2, params["g3"], params["b3"], 0.2)  # down3
    x = conv_block(x, params["w4"], 1, params["g4"], params["b4"], 0.2)  # conv4+bn4+relu4
    x = conv_block(x, params["w5"], 1, None, None, None,
                   out_dtype=jnp.float32)                                # conv5 (no BN/act)

    return jnp.transpose(x, (0, 3, 1, 2))  # back to NCHW


def init_params(key, input_channels=3):
    ks = jax.random.split(key, 5)

    def w(k, cin, cout):
        # weights stored HWIO: (kh, kw, Cin, Cout)
        return 0.05 * jax.random.normal(k, (4, 4, cin, cout), jnp.float32)

    p = {
        "w1": w(ks[0], input_channels * 2, 64),
        "w2": w(ks[1], 64, 128),
        "w3": w(ks[2], 128, 256),
        "w4": w(ks[3], 256, 512),
        "w5": w(ks[4], 512, 1),
        # BatchNorm affine params (PyTorch default init: gamma=1, beta=0)
        "g2": jnp.ones((128,), jnp.float32), "b2": jnp.zeros((128,), jnp.float32),
        "g3": jnp.ones((256,), jnp.float32), "b3": jnp.zeros((256,), jnp.float32),
        "g4": jnp.ones((512,), jnp.float32), "b4": jnp.zeros((512,), jnp.float32),
    }
    return p


if __name__ == "__main__":
    key = jax.random.PRNGKey(0)
    kp, ki, kt = jax.random.split(key, 3)

    params = init_params(kp, input_channels=3)
    # small but valid spatial size: 32 -> 16 -> 8 -> 4 -> 3 -> 2
    input_image = jax.random.normal(ki, (2, 3, 32, 32), jnp.float32)
    target_image = jax.random.normal(kt, (2, 3, 32, 32), jnp.float32)

    out = discriminator_forward(params, input_image, target_image)
    out = jax.block_until_ready(out)
    assert out.shape == (2, 1, 2, 2), out.shape
    print("KERNEL_OK")
</pallas_src>

<mosaic_0001>
module attributes {stable_mosaic.version = 11 : i64} {
  func.func @_gemm_act_kernel(%arg0: i32, %arg1: memref<256x96xbf16, #tpu.memory_space<vmem>>, %arg2: memref<96x128xbf16, #tpu.memory_space<vmem>>, %arg3: memref<256x128xbf16, #tpu.memory_space<vmem>>) attributes {dimension_semantics = [#tpu.dimension_semantics<parallel>], iteration_bounds = array<i64: 2>, scalar_prefetch = 0 : i64, scratch_operands = 0 : i64, tpu.core_type = #tpu.core_type<tc>, window_params = [{transform_indices = @transform_0, window_bounds = array<i64: 256, 96>}, {pipeline_mode = #tpu.pipeline_mode<synchronous>, transform_indices = @transform_1, window_bounds = array<i64: 96, 128>}, {transform_indices = @transform_2, window_bounds = array<i64: 256, 128>}]} {
    %c0 = arith.constant 0 : index
    %c0_0 = arith.constant 0 : index
    %0 = vector.load %arg1[%c0, %c0_0] : memref<256x96xbf16, #tpu.memory_space<vmem>>, vector<256x96xbf16>
    %c0_1 = arith.constant 0 : index
    %c0_2 = arith.constant 0 : index
    %1 = vector.load %arg2[%c0_1, %c0_2] : memref<96x128xbf16, #tpu.memory_space<vmem>>, vector<96x128xbf16>
    %cst = arith.constant dense<0.000000e+00> : vector<256x128xf32>
    %2 = tpu.matmul %0, %1, %cst {dimension_numbers = #tpu.dot_dimension_numbers<[1], [0], [0], [1], [0, 0, 1, 1], [], []>} : vector<256x96xbf16>, vector<96x128xbf16>, vector<256x128xf32> -> vector<256x128xf32>
    %cst_3 = arith.constant 0.000000e+00 : f32
    %3 = vector.broadcast %cst_3 : f32 to vector<256x128xf32>
    %4 = arith.cmpf oge, %2, %3 : vector<256x128xf32>
    %cst_4 = arith.constant 2.000000e-01 : f32
    %5 = vector.broadcast %cst_4 : f32 to vector<256x128xf32>
    %6 = arith.mulf %5, %2 : vector<256x128xf32>
    %7 = arith.select %4, %2, %6 : vector<256x128xi1>, vector<256x128xf32>
    %8 = arith.truncf %7 : vector<256x128xf32> to vector<256x128xbf16>
    %c0_5 = arith.constant 0 : index
    %c0_6 = arith.constant 0 : index
    %9 = vector.load %arg3[%c0_5, %c0_6] : memref<256x128xbf16, #tpu.memory_space<vmem>>, vector<256x128xbf16>
    tpu.vector_store %arg3[%c0_5, %c0_6], %8 {strides = array<i32>} : memref<256x128xbf16, #tpu.memory_space<vmem>>, vector<256x128xbf16>,
    return
  }
  func.func @transform_0(%arg0: i32) -> (i32, i32) {
    %c0_i32 = arith.constant 0 : i32
    %c0_i32_0 = arith.constant 0 : i32
    return %arg0, %c0_i32 : i32, i32
  }
  func.func @transform_1(%arg0: i32) -> (i32, i32) {
    %c0_i32 = arith.constant 0 : i32
    %c0_i32_0 = arith.constant 0 : i32
    %c0_i32_1 = arith.constant 0 : i32
    return %c0_i32, %c0_i32_0 : i32, i32
  }
  func.func @transform_2(%arg0: i32) -> (i32, i32) {
    %c0_i32 = arith.constant 0 : i32
    %c0_i32_0 = arith.constant 0 : i32
    return %arg0, %c0_i32 : i32, i32
  }
}

</mosaic_0001>

<bundles_post_ra>
// kernel: tpu_custom_call.1
= control target key start
LH: loop header
LB: loop body
LE: loop exit
PB: predicated region body
PF: predicated region fallthrough
CT: control target
= control target key end

     0   :  { %7 = vsyncpa [#allocation3], 0  ;;  %s1461_s0 = inlined_call_operand.vmem [shape: bf16[512,96], index: 0, kind: input, shape index: {}]   ;;  %s1462_s1 = inlined_call_operand.vmem [shape: bf16[96,128], index: 1, kind: input, shape index: {}]   ;;  %s1463_s2 = inlined_call_operand.hbm [shape: bf16[512,128], index: 2, kind: output, shape index: {}]  }
   0x1   :  { %9 = vsyncpa [#allocation3 + $0x1], 0  ;;  %s1279_s9 = smov 0   ;;  %s1281_s10 = smov 0  }
   0x2   :  { %s1283_s11 = smov 0   ;;  %s1285_s12 = smov 0  }
   0x3 LB: > { %s1300_s13 = sadd.s32 4294967295, %s1259_s12   ;;  %s848_s14 = sadd.s32 4294967294, %s1259_s12   ;;  %s1259_s12 = sphi %s1285_s12, %s1469_s12   ;;  %s1255_s11 = sphi %s1283_s11, %s1468_s11   ;;  %s1251_s10 = sphi %s1281_s10, %s1467_s10   ;;  %s1247_s9 = sphi %s1279_s9, %s1466_s9  }
   0x4   : > { %s1304_s15 = sadd.s32 1, %s1259_s12   ;;  %s69_s16 = sadd.s32 1, %s1255_s11 }
   0x5   : > { %s66_s17 = ssub.s32 %s1259_s12, %s1304_s15  ;;  %p79_p0 = scmp.ne.s32.totalorder %s1255_s11, %s1251_s10 }
   0x6   : > { %p67_p1 = scmp.eq.s32.totalorder %s66_s17, 0  ;;  %p80_p2 = scmp.eq.s32.totalorder %s1300_s13, 1 }
   0x7   : > { %p85_p3 = scmp.ne.s32.totalorder %s1251_s10, %s1247_s9  ;;  %p86_p4 = scmp.eq.s32.totalorder %s848_s14, 1 }
   0x8   : > { %s1315_s18 = scalar_select %p67_p1, %s1255_s11, %s69_s16  }
   0x9   : > { %p1317_p5 = por %p80_p2, %p79_p0  ;;  %p1321_p6 = por %p86_p4, %p85_p3 }
   0xa   : > { %p851_p7 = scmp.ge.s32.totalorder %s1259_s12, 1  ;;  %p116_p8 = scmp.lt.s32.totalorder %s1259_s12, 3 }
   0xc   : > { %p117_p9 = pnand %p851_p7, %p116_p8 }
   0xd   : > { %s853_s23 = sshll.u32 (!%p117_p9), %s1300_s13, 5  ;;  %s135_s16 = sand.u32 (!%p117_p9), 1, %s1251_s10  }
   0xe   : > { %120 = sbr.rel (%p117_p9) target bundleno = 287 (0x11f), region = 28  ;;  %p139_p10 = scmp.lt.s32.totalorder (!%p117_p9), %s853_s23, 63 }
   0xf   : > { %s852_s17 = sshll.u32 (!%p117_p9), %s135_s16, 7  ;;  %s962_s22 = sshll.u32 (!%p117_p9), %s1300_s13, 11 }
  0x10   : > { %s1387_s21 = scalar_lea.vmem (!%p117_p9), [#allocation2], %s852_s17  ;;  %s1412_s25 = scalar_lea.hbm (!%p117_p9), %s1463_s2, %s962_s22 }
  0x11   : > { %s1421_s26 = scalar_lea.sflag (!%p117_p9), [#allocation3], %s135_s16 }
  0x13   : > { %v1177_v0 = vld [vmem:[%s1462_s1 + $0x28] sm:$0xff]   ;;  %v1178_v1 = vld [vmem:[%s1462_s1 + $0x20] sm:$0xff]   ;;  %s1471_s23 = smov (!%p139_p10, %s853_s23), 63  ;;  %v1179_v2 = vld [vmem:[%s1462_s1 + $0x18] sm:$0xff]   ;;  %vm306_vm0 = vcmask 785408  }
  0x14   : > { %1080 = vmatprep.subr.bf16.mxu0 %v1177_v0  ;;  %1124 = vmatprep.subr.bf16.mxu1 %v1177_v0  ;;  %s854_s28 = sshll.u32 %s1471_s23, 2  ;;  %v1180_v3 = vld [vmem:[%s1462_s1 + $0x10] sm:$0xff]   ;;  %v1181_v6 = vld [vmem:[%s1462_s1 + $0x8] sm:$0xff]   ;;  %v1182_v7 = vld [vmem:[%s1462_s1] sm:$0xff]   ;;  %s786_s23 = sshll.u32 %s1387_s21, 4  ;;  %s1414_s23 = int_to_ptr.vmem [resolvable:$true] %s786_s23 }
  0x15   : > { %1081 = vmatpush3.bf16.msra.mxu0 %v1177_v0  ;;  %1130 = vmatpush3.bf16.msra.mxu1 %v1177_v0  ;;  %s1343_s5 = scalar_lea.vmem %s1461_s0, %s854_s28  ;;  %s1199_s27 = scalar_lea.vmem %s1414_s23, 2048 }
  0x16   : > { %1082 = vmatprep.subr.bf16.mxu0 %v1178_v1  ;;  %1125 = vmatprep.subr.bf16.mxu1 %v1178_v1  ;;  %v1183_v4 = vld [vmem:[%s1343_s5] sm:$0xff]   ;;  %v1185_v8 = vld [vmem:[%s1343_s5 + $0x8] sm:$0xff]   ;;  %v1187_v10 = vld [vmem:[%s1343_s5 + $0x10] sm:$0xff]   ;;  %p1200_p11 = scmp.ne.s32.totalorder %s1414_s23, %s1199_s27  ;;  %s1261_s28 = smov [#allocation2]  }
  0x17   : > { %v1184_v5 = vld [vmem:[%s1343_s5 + $0x40] sm:$0xff]   ;;  %1092 = vmatprep.mubr.msk.bf16.mxu0 %vm306_vm0, %v1183_v4  ;;  %v1186_v9 = vld [vmem:[%s1343_s5 + $0x48] sm:$0xff]   ;;  %v1188_v11 = vld [vmem:[%s1343_s5 + $0x50] sm:$0xff]   ;;  %s1203_s29 = sshll.u32 %s1261_s28, 4  ;;  %s1204_s29 = int_to_ptr.vmem [resolvable:$false] %s1203_s29 }
  0x18   : > { %1108 = vmatprep.mubr.msk.bf16.mxu1 %vm306_vm0, %v1184_v5  ;;  %v1189_v12 = vld [vmem:[%s1343_s5 + $0x18] sm:$0xff]   ;;  %v1191_v14 = vld [vmem:[%s1343_s5 + $0x20] sm:$0xff]   ;;  %v1193_v16 = vld [vmem:[%s1343_s5 + $0x28] sm:$0xff]   ;;  %p1201_p12 = pnand %p1200_p11, %p1317_p5  ;;  %s1205_s30 = scalar_lea.vmem %s1204_s29, 4096 }
  0x19   : > { %1083 = vmatpush3.bf16.msra.mxu0 %v1178_v1  ;;  %1131 = vmatpush3.bf16.msra.mxu1 %v1178_v1  ;;  %v1190_v13 = vld [vmem:[%s1343_s5 + $0x58] sm:$0xff]   ;;  %v1192_v15 = vld [vmem:[%s1343_s5 + $0x60] sm:$0xff]   ;;  %v1194_v17 = vld [vmem:[%s1343_s5 + $0x68] sm:$0xff]   ;;  %p1206_p0 = scmp.lt.s32.totalorder %s1414_s23, %s1204_s29  ;;  %p1207_p1 = scmp.lt.s32.totalorder %s1205_s30, %s1199_s27 }
  0x1a   : > { %1084 = vmatprep.subr.bf16.mxu0 %v1179_v2  ;;  %1126 = vmatprep.subr.bf16.mxu1 %v1179_v2  ;;  %v1195_v18 = vld [vmem:[%s1343_s5 + $0x30] sm:$0xff]   ;;  %v1197_v20 = vld [vmem:[%s1343_s5 + $0x38] sm:$0xff]   ;;  %p1202_p13 = pneg %p1201_p12 }
  0x1b   : > { %v1196_v19 = vld [vmem:[%s1343_s5 + $0x70] sm:$0xff]   ;;  %v1198_v21 = vld [vmem:[%s1343_s5 + $0x78] sm:$0xff]   ;;  %p1208_p2 = por %p1207_p1, %p1206_p0 }
  0x1d   : > { %1085 = vmatpush3.bf16.msra.mxu0 %v1179_v2  ;;  %1132 = vmatpush3.bf16.msra.mxu1 %v1179_v2  ;;  %p1209_p3 = pnand %p1208_p2, %p1202_p13 }
  0x1e   : > { %1086 = vmatprep.subr.bf16.mxu0 %v1180_v3  ;;  %1127 = vmatprep.subr.bf16.mxu1 %v1180_v3 }
  0x21   : > { %1087 = vmatpush3.bf16.msra.mxu0 %v1180_v3  ;;  %1133 = vmatpush3.bf16.msra.mxu1 %v1180_v3 }
  0x22   : > { %1088 = vmatprep.subr.bf16.mxu0 %v1181_v6  ;;  %1128 = vmatprep.subr.bf16.mxu1 %v1181_v6 }
  0x25   : > { %1089 = vmatpush3.bf16.msra.mxu0 %v1181_v6  ;;  %1134 = vmatpush3.bf16.msra.mxu1 %v1181_v6 }
  0x26   : > { %1090 = vmatprep.subr.bf16.mxu0 %v1182_v7  ;;  %1129 = vmatprep.subr.bf16.mxu1 %v1182_v7 }
  0x29   : > { %1091 = vmatpush3.bf16.msra.mxu0 %v1182_v7  ;;  %1135 = vmatpush3.bf16.msra.mxu1 %v1182_v7 }
  0x2c   : > { %1093 = vmatmul.mubr.msk.bf16.vlgmr.msra.gmra.mxu0 %vm306_vm0, %v1185_v8  ;;  %1109 = vmatmul.mubr.msk.bf16.vlgmr.msra.gmra.mxu1 %vm306_vm0, %v1186_v9 }
  0x2d   : > { %1096 = vmatprep.mubr.msk.bf16.mxu0 %vm306_vm0, %v1187_v10  ;;  %1112 = vmatprep.mubr.msk.bf16.mxu1 %vm306_vm0, %v1188_v11 }
  0x34   : > { %1097 = vmatmul.mubr.msk.bf16.gmra.mxu0 %vm306_vm0, %v1189_v12  ;;  %1113 = vmatmul.mubr.msk.bf16.gmra.mxu1 %vm306_vm0, %v1190_v13 }
  0x35   : > { %1100 = vmatprep.mubr.msk.bf16.mxu0 %vm306_vm0, %v1191_v14  ;;  %1116 = vmatprep.mubr.msk.bf16.mxu1 %vm306_vm0, %v1192_v15 }
  0x3c   : > { %1101 = vmatmul.mubr.msk.bf16.gmra.mxu0 %vm306_vm0, %v1193_v16  ;;  %1117 = vmatmul.mubr.msk.bf16.gmra.mxu1 %vm306_vm0, %v1194_v17 }
  0x3d   : > { %1104 = vmatprep.mubr.msk.bf16.mxu0 %vm306_vm0, %v1195_v18  ;;  %1120 = vmatprep.mubr.msk.bf16.mxu1 %vm306_vm0, %v1196_v19 }
  0x44   : > { %1105 = vmatmul.mubr.msk.bf16.gmra.mxu0 %vm306_vm0, %v1197_v20  ;;  %1121 = vmatmul.mubr.msk.bf16.gmra.mxu1 %vm306_vm0, %v1198_v21 }
  0xec   : > { %v1094_v22 = vpop.f32.mrf.mxu0  ;;  %v1110_v23 = vpop.f32.mrf.mxu1 }
  0xed   : > { %vm518_vm1 = vcmp.ge.f32.partialorder %v1094_v22, 0.0  ;;  %v550_v24 = vmul.f32 0.2, %v1094_v22  ;;  %v566_v25 = vmul.f32 0.2, %v1110_v23  ;;  %vm534_vm2 = vcmp.ge.f32.partialorder %v1110_v23, 0.0 }
  0xee   : > { %v389_v26 = vpop.f32.mrf.mxu0  ;;  %v453_v27 = vpop.f32.mrf.mxu1 }
  0xef   : > { %v582_v28 = vsel %vm518_vm1, %v1094_v22, %v550_v24  ;;  %v548_v29 = vmul.f32 0.2, %v389_v26  ;;  %vm516_vm3 = vcmp.ge.f32.partialorder %v389_v26, 0.0  ;;  %v598_v33 = vsel %vm534_vm2, %v1110_v23, %v566_v25 }
  0xf0   : > { %v1095_v30 = vpop.f32.mrf.mxu0  ;;  %v1111_v31 = vpop.f32.mrf.mxu1  ;;  %vm532_vm6 = vcmp.ge.f32.partialorder %v453_v27, 0.0  ;;  %v564_v34 = vmul.f32 0.2, %v453_v27 }
  0xf1   : > { %vm519_vm4 = vcmp.ge.f32.partialorder %v1095_v30, 0.0  ;;  %v551_v32 = vmul.f32 0.2, %v1095_v30  ;;  %vm535_vm5 = vcmp.ge.f32.partialorder %v1111_v31, 0.0  ;;  %v567_v35 = vmul.f32 0.2, %v1111_v31 }
  0xf2   : > { %v392_v36 = vpop.f32.mrf.mxu0  ;;  %v456_v37 = vpop.f32.mrf.mxu1  ;;  %v580_v40 = vsel %vm516_vm3, %v389_v26, %v548_v29  ;;  %v596_v49 = vsel %vm532_vm6, %v453_v27, %v564_v34 }
  0xf3   : > { %v583_v38 = vsel %vm519_vm4, %v1095_v30, %v551_v32  ;;  %vm517_vm7 = vcmp.ge.f32.partialorder %v392_v36, 0.0  ;;  %v549_v39 = vmul.f32 0.2, %v392_v36  ;;  %vm533_vm8 = vcmp.ge.f32.partialorder %v456_v37, 0.0 }
  0xf4   : > { %v971_v41 = vpack.c.bf16 %v583_v38, %v582_v28  ;;  %v599_v42 = vsel %vm535_vm5, %v1111_v31, %v567_v35  ;;  %v565_v43 = vmul.f32 0.2, %v456_v37  ;;  %v1098_v44 = vpop.f32.mrf.mxu0  ;;  %v1114_v45 = vpop.f32.mrf.mxu1 }
  0xf5   : > { %v1011_v46 = vpack.c.bf16 %v599_v42, %v598_v33  ;;  %v581_v47 = vsel %vm517_vm7, %v392_v36, %v549_v39  ;;  %vm522_vm9 = vcmp.ge.f32.partialorder %v1098_v44, 0.0  ;;  %v554_v48 = vmul.f32 0.2, %v1098_v44 }
  0xf6   : > { %1043 = vst [vmem:[%s1387_s21 + $0x8] sm:$0xff] %v971_v41   ;;  %v966_v50 = vpack.c.bf16 %v581_v47, %v580_v40  ;;  %v597_v51 = vsel %vm533_vm8, %v456_v37, %v565_v43  ;;  %v570_v52 = vmul.f32 0.2, %v1114_v45  ;;  %v405_v53 = vpop.f32.mrf.mxu0  ;;  %v469_v54 = vpop.f32.mrf.mxu1  ;;  %vm538_vm10 = vcmp.ge.f32.partialorder %v1114_v45, 0.0 }
  0xf7   : > { %1051 = vst [vmem:[%s1387_s21 + $0x48] sm:$0xff] %v1011_v46   ;;  %v1006_v55 = vpack.c.bf16 %v597_v51, %v596_v49  ;;  %v586_v56 = vsel %vm522_vm9, %v1098_v44, %v554_v48  ;;  %v552_v57 = vmul.f32 0.2, %v405_v53  ;;  %vm520_vm11 = vcmp.ge.f32.partialorder %v405_v53, 0.0 }
  0xf8   : > { %967 = vst [vmem:[%s1387_s21] sm:$0xff] %v966_v50   ;;  %v1099_v58 = vpop.f32.mrf.mxu0  ;;  %v1115_v59 = vpop.f32.mrf.mxu1  ;;  %v602_v61 = vsel %vm538_vm10, %v1114_v45, %v570_v52  ;;  %vm536_vm14 = vcmp.ge.f32.partialorder %v469_v54, 0.0  ;;  %v568_v62 = vmul.f32 0.2, %v469_v54 }
  0xf9   : > { %1050 = vst [vmem:[%s1387_s21 + $0x40] sm:$0xff] %v1006_v55   ;;  %vm523_vm12 = vcmp.ge.f32.partialorder %v1099_v58, 0.0  ;;  %v555_v60 = vmul.f32 0.2, %v1099_v58  ;;  %vm539_vm13 = vcmp.ge.f32.partialorder %v1115_v59, 0.0  ;;  %v584_v4 = vsel %vm520_vm11, %v405_v53, %v552_v57 }
  0xfa   : > { %v571_v63 = vmul.f32 0.2, %v1115_v59  ;;  %v408_v0 = vpop.f32.mrf.mxu0  ;;  %v472_v1 = vpop.f32.mrf.mxu1  ;;  %v600_v13 = vsel %vm536_vm14, %v469_v54, %v568_v62 }
  0xfb   : > { %v587_v2 = vsel %vm523_vm12, %v1099_v58, %v555_v60  ;;  %vm521_vm15 = vcmp.ge.f32.partialorder %v408_v0, 0.0  ;;  %v553_v3 = vmul.f32 0.2, %v408_v0  ;;  %vm537_vm0 = vcmp.ge.f32.partialorder %v472_v1, 0.0 }
  0xfc   : > { %v981_v5 = vpack.c.bf16 %v587_v2, %v586_v56  ;;  %v603_v6 = vsel %vm539_vm13, %v1115_v59, %v571_v63  ;;  %v569_v7 = vmul.f32 0.2, %v472_v1  ;;  %v1102_v8 = vpop.f32.mrf.mxu0  ;;  %v1118_v9 = vpop.f32.mrf.mxu1 }
  0xfd   : > { %v1021_v10 = vpack.c.bf16 %v603_v6, %v602_v61  ;;  %v585_v11 = vsel %vm521_vm15, %v408_v0, %v553_v3  ;;  %vm526_vm1 = vcmp.ge.f32.partialorder %v1102_v8, 0.0  ;;  %v558_v12 = vmul.f32 0.2, %v1102_v8 }
  0xfe   : > { %1045 = vst [vmem:[%s1387_s21 + $0x18] sm:$0xff] %v981_v5   ;;  %v976_v14 = vpack.c.bf16 %v585_v11, %v584_v4  ;;  %v601_v15 = vsel %vm537_vm0, %v472_v1, %v569_v7  ;;  %v574_v16 = vmul.f32 0.2, %v1118_v9  ;;  %v421_v17 = vpop.f32.mrf.mxu0  ;;  %v485_v18 = vpop.f32.mrf.mxu1  ;;  %vm542_vm2 = vcmp.ge.f32.partialorder %v1118_v9, 0.0 }
  0xff   : > { %1053 = vst [vmem:[%s1387_s21 + $0x58] sm:$0xff] %v1021_v10   ;;  %v1016_v19 = vpack.c.bf16 %v601_v15, %v600_v13  ;;  %v590_v20 = vsel %vm526_vm1, %v1102_v8, %v558_v12  ;;  %v556_v21 = vmul.f32 0.2, %v421_v17  ;;  %vm524_vm3 = vcmp.ge.f32.partialorder %v421_v17, 0.0 }
 0x100   : > { %1044 = vst [vmem:[%s1387_s21 + $0x10] sm:$0xff] %v976_v14   ;;  %v1103_v22 = vpop.f32.mrf.mxu0  ;;  %v1119_v23 = vpop.f32.mrf.mxu1  ;;  %v606_v25 = vsel %vm542_vm2, %v1118_v9, %v574_v16  ;;  %vm540_vm6 = vcmp.ge.f32.partialorder %v485_v18, 0.0  ;;  %v572_v26 = vmul.f32 0.2, %v485_v18 }
 0x101   : > { %1052 = vst [vmem:[%s1387_s21 + $0x50] sm:$0xff] %v1016_v19   ;;  %vm527_vm4 = vcmp.ge.f32.partialorder %v1103_v22, 0.0  ;;  %v559_v24 = vmul.f32 0.2, %v1103_v22  ;;  %vm543_vm5 = vcmp.ge.f32.partialorder %v1119_v23, 0.0  ;;  %v588_v32 = vsel %vm524_vm3, %v421_v17, %v556_v21 }
 0x102   : > { %v575_v27 = vmul.f32 0.2, %v1119_v23  ;;  %v424_v28 = vpop.f32.mrf.mxu0  ;;  %v488_v29 = vpop.f32.mrf.mxu1  ;;  %v604_v41 = vsel %vm540_vm6, %v485_v18, %v572_v26 }
 0x103   : > { %v591_v30 = vsel %vm527_vm4, %v1103_v22, %v559_v24  ;;  %vm525_vm7 = vcmp.ge.f32.partialorder %v424_v28, 0.0  ;;  %v557_v31 = vmul.f32 0.2, %v424_v28  ;;  %vm541_vm8 = vcmp.ge.f32.partialorder %v488_v29, 0.0 }
 0x104   : > { %v991_v33 = vpack.c.bf16 %v591_v30, %v590_v20  ;;  %v607_v34 = vsel %vm543_vm5, %v1119_v23, %v575_v27  ;;  %v573_v35 = vmul.f32 0.2, %v488_v29  ;;  %v1106_v36 = vpop.f32.mrf.mxu0  ;;  %v1122_v37 = vpop.f32.mrf.mxu1 }
 0x105   : > { %v1031_v38 = vpack.c.bf16 %v607_v34, %v606_v25  ;;  %v589_v39 = vsel %vm525_vm7, %v424_v28, %v557_v31  ;;  %vm530_vm9 = vcmp.ge.f32.partialorder %v1106_v36, 0.0  ;;  %v562_v40 = vmul.f32 0.2, %v1106_v36 }
 0x106   : > { %1047 = vst [vmem:[%s1387_s21 + $0x28] sm:$0xff] %v991_v33   ;;  %v986_v42 = vpack.c.bf16 %v589_v39, %v588_v32  ;;  %v605_v43 = vsel %vm541_vm8, %v488_v29, %v573_v35  ;;  %v437_v44 = vpop.f32.mrf.mxu0  ;;  %v501_v45 = vpop.f32.mrf.mxu1  ;;  %vm546_vm10 = vcmp.ge.f32.partialorder %v1122_v37, 0.0  ;;  %v578_v48 = vmul.f32 0.2, %v1122_v37 }
 0x107   : > { %1055 = vst [vmem:[%s1387_s21 + $0x68] sm:$0xff] %v1031_v38   ;;  %v1026_v46 = vpack.c.bf16 %v605_v43, %v604_v41  ;;  %v594_v47 = vsel %vm530_vm9, %v1106_v36, %v562_v40  ;;  %v560_v51 = vmul.f32 0.2, %v437_v44  ;;  %vm528_vm13 = vcmp.ge.f32.partialorder %v437_v44, 0.0 }
 0x108   : > { %1046 = vst [vmem:[%s1387_s21 + $0x20] sm:$0xff] %v986_v42   ;;  %v1107_v49 = vpop.f32.mrf.mxu0  ;;  %v1123_v50 = vpop.f32.mrf.mxu1  ;;  %vm544_vm14 = vcmp.ge.f32.partialorder %v501_v45, 0.0  ;;  %v576_v53 = vmul.f32 0.2, %v501_v45  ;;  %v610_v59 = vsel %vm546_vm10, %v1122_v37, %v578_v48 }
 0x109   : > { %1054 = vst [vmem:[%s1387_s21 + $0x60] sm:$0xff] %v1026_v46   ;;  %vm531_vm11 = vcmp.ge.f32.partialorder %v1107_v49, 0.0  ;;  %v563_v52 = vmul.f32 0.2, %v1107_v49  ;;  %vm547_vm12 = vcmp.ge.f32.partialorder %v1123_v50, 0.0  ;;  %v592_v63 = vsel %vm528_vm13, %v437_v44, %v560_v51 }
 0x10a   : > { %v579_v54 = vmul.f32 0.2, %v1123_v50  ;;  %v440_v55 = vpop.f32.mrf.mxu0  ;;  %v504_v56 = vpop.f32.mrf.mxu1  ;;  %v608_v2 = vsel %vm544_vm14, %v501_v45, %v576_v53 }
 0x10b   : > { %v595_v57 = vsel %vm531_vm11, %v1107_v49, %v563_v52  ;;  %vm529_vm15 = vcmp.ge.f32.partialorder %v440_v55, 0.0  ;;  %v561_v58 = vmul.f32 0.2, %v440_v55  ;;  %vm545_vm0 = vcmp.ge.f32.partialorder %v504_v56, 0.0 }
 0x10c   : > { %v1001_v60 = vpack.c.bf16 %v595_v57, %v594_v47  ;;  %v611_v61 = vsel %vm547_vm12, %v1123_v50, %v579_v54  ;;  %v577_v62 = vmul.f32 0.2, %v504_v56 }
 0x10d   : > { %v1041_v0 = vpack.c.bf16 %v611_v61, %v610_v59  ;;  %v593_v1 = vsel %vm529_vm15, %v440_v55, %v561_v58 }
 0x10e   : > { %1049 = vst [vmem:[%s1387_s21 + $0x38] sm:$0xff] %v1001_v60   ;;  %v996_v3 = vpack.c.bf16 %v593_v1, %v592_v63  ;;  %v609_v4 = vsel %vm545_vm0, %v504_v56, %v577_v62 }
 0x10f   : > { %1057 = vst [vmem:[%s1387_s21 + $0x78] sm:$0xff] %v1041_v0   ;;  %v1036_v5 = vpack.c.bf16 %v609_v4, %v608_v2 }
 0x110   : > { %1048 = vst [vmem:[%s1387_s21 + $0x30] sm:$0xff] %v996_v3  }
 0x111   : > { %1056 = vst [vmem:[%s1387_s21 + $0x70] sm:$0xff] %v1036_v5  }
 0x112   : > { %1212 = shalt.err (!%p1209_p3)
}
 0x113   : > { %s1213_s3 = scalar_lea.hbm %s1412_s25, 2048  ;;  %s1217_s6 = scalar_lea.hbm %s1463_s2, 4096 }
 0x114   : > { %p1214_p4 = scmp.ne.s32.totalorder %s1412_s25, %s1213_s3  ;;  %p1218_p9 = scmp.lt.s32.totalorder %s1412_s25, %s1463_s2 }
 0x115   : > { %p1219_p10 = scmp.lt.s32.totalorder %s1217_s6, %s1213_s3 }
 0x116   : > { %p1215_p7 = pnand %p1214_p4, %p1317_p5 }
 0x117   : > { %p1220_p11 = por %p1219_p10, %p1218_p9 }
 0x118   : > { %p1216_p8 = pneg %p1215_p7 }
 0x11a   : > { %p1221_p12 = pnand %p1220_p11, %p1216_p8 }
 0x11c   : > { %1224 = shalt.err (!%p1221_p12)
}
 0x11d   : > { %s1262_s14 = smov 64   ;;  %s1263_s16 = smov 4  }
 0x11e   : > { %1136 = dma.vmem_to_hbm [thread:$0]  (%p1317_p5), %s1414_s23, 2048, %s1412_s25, %s1421_s26, %s1262_s14, %s1262_s14, %s1263_s16  }
 0x11f PF: > { %p1142_p13 = scmp.ge.s32.totalorder %s1259_s12, 2  ;;  %s801_s17 = sand.u32 1, %s1247_s9  }
 0x120   : > { %s802_s21 = scalar_lea.sflag [#allocation3], %s801_s17 }
 0x121   : > { %p1139_p0 = pnand %p1142_p13, %p1321_p6 }
 0x123   : > { %p1140_p1 = pneg %p1139_p0 }
 0x125   : > { %1242 = dma.done.wait (%p1140_p1), %s802_s21, 2048  }
 0x126   : > { %1244 = vsyncadd (%p1140_p1), %s802_s21, 4294965248  ;;  %p12_p2 = scmp.ge.s32.totalorder %s1304_s15, 4   ;;  %s1466_s9 = smov %s1251_s10 }
 0x127   : > { %s1467_s10 = smov %s1255_s11  ;;  %s1468_s11 = smov %s1315_s18 }
 0x128   : > { %s1469_s12 = smov %s1304_s15  ;;  %14 = sbr.rel (!%p12_p2) target bundleno = 3 (0x3), region = 63 }
 0x12d   :  { %807 = vsyncpa [#allocation3], 1 }
 0x12e   :  { %809 = vsyncpa [#allocation3 + $0x1], 1 }

</bundles_post_ra>
